<compile_context>
chip_gen: v5e
topology: v5e:2x2
jax: 0.10.0
libtpu: 0.0.40
codegen_flags: <defaults>
</compile_context>

<pallas_src>
import numpy as np
import jax
import jax.numpy as jnp
from jax.experimental import pallas as pl
from jax.experimental.pallas import tpu as pltpu  # noqa: F401  (TPU backend)

# ----------------------------- config (args) --------------------------------
N_BATCH = 2
IN_C = 3            # args.skeleton_feature_dim
T_FRAMES = 8
V_NODES = 7         # synthetic skeleton graph vertices (args.graph)
CONV3D_OUT = 16     # args.conv3D_out_dim
VF_OUT = 32         # args.vertices_fusion_out_dim
NUM_SCALES = 4      # args.num_scales
WIN_SIZE = 3        # args.window_size
WIN_STRIDE = 2      # args.window_stride
WIN_DIL = 1         # args.window_dilation
BN_EPS = 1e-5


# ----------------------- graph construction (host, numpy) -------------------
def k_adjacency(A, k, with_self=False, self_factor=1.0):
    I = np.eye(len(A), dtype=A.dtype)
    if k == 0:
        return I
    Ak = (np.minimum(np.linalg.matrix_power(A + I, k), 1)
          - np.minimum(np.linalg.matrix_power(A + I, k - 1), 1))
    if with_self:
        Ak = Ak + self_factor * I
    return Ak


def normalize_adjacency_matrix(A):
    deg = A.sum(-1)
    dinv = np.power(deg, -0.5)
    D = np.eye(len(deg)) * dinv
    return (D @ A @ D).astype(np.float32)


def build_A_scales(A_binary, window_size, num_scales):
    V = len(A_binary)
    A_with_I = A_binary + np.eye(V, dtype=A_binary.dtype)
    A_large = np.tile(A_with_I, (window_size, window_size)).astype(np.float32)
    scales = [k_adjacency(A_large, k, with_self=True) for k in range(num_scales)]
    return np.concatenate([normalize_adjacency_matrix(g) for g in scales], axis=0)


def make_chain_graph(V):
    A = np.zeros((V, V), dtype=np.float32)
    for i in range(V - 1):
        A[i, i + 1] = 1.0
        A[i + 1, i] = 1.0
    A[0, V // 2] = 1.0
    A[V // 2, 0] = 1.0
    return A


# ------------------------------ fused Pallas kernel --------------------------
def _fused_kernel(x_ref, w2_ref, s1_ref, b1_ref,
                  w3_ref, s2_ref, b2_ref,
                  w4_ref, s3_ref, b3_ref, mavg_ref, o_ref):
    # Rows = (n, t') for every stage; features change per stage.  Everything is
    # resident in VMEM; four small MXU matmuls, VPU affine+ReLU in between.
    # Stage 1: graph aggregation folded into MLP 1x1 conv + BN + ReLU.
    h = jnp.dot(x_ref[...], w2_ref[...], preferred_element_type=jnp.float32)
    h = jnp.maximum(h * s1_ref[...] + b1_ref[...], 0.0)            # (NT', Vp*Cm)
    # Stage 2: Conv3d (1, ws, 1) + BN (block-diagonal folded weight, no ReLU).
    h = jnp.dot(h, w3_ref[...], preferred_element_type=jnp.float32)
    h = h * s2_ref[...] + b2_ref[...]                              # (NT', V*Cm)
    # Stage 3: VerticesFusion 1x1 conv + BN + ReLU (block-diagonal weight).
    h = jnp.dot(h, w4_ref[...], preferred_element_type=jnp.float32)
    h = jnp.maximum(h * s3_ref[...] + b3_ref[...], 0.0)            # (NT', V*VF)
    # Stage 4: mean over vertices as a matmul with a constant averaging matrix.
    o_ref[...] = jnp.dot(h, mavg_ref[...], preferred_element_type=jnp.float32)


@jax.jit
def local_feature_pallas(x, f):
    """x: (N, C, T, V) -> (N, VF_OUT, T_out). One pallas_call, grid=()."""
    N, C, T, V = x.shape
    ws, stride, dil = WIN_SIZE, WIN_STRIDE, WIN_DIL
    pad = (ws + (ws - 1) * (dil - 1) - 1) // 2
    T_out = (T + 2 * pad - dil * (ws - 1) - 1) // stride + 1

    # UnfoldTemporalWindows as static strided slices (host-side glue, ~2 KB).
    xp = jnp.pad(x, ((0, 0), (0, 0), (pad, pad), (0, 0)))
    cols = [xp[:, :, w * dil: w * dil + (T_out - 1) * stride + 1: stride, :]
            for w in range(ws)]
    xw = jnp.stack(cols, axis=3)                                   # (N,C,T',ws,V)
    # rows = (n, t'); features ordered (c, w, v) = c*Vp + u with u = w*V + v.
    x_flat = xw.transpose(0, 2, 1, 3, 4).reshape(N * T_out, C * ws * V)

    out = pl.pallas_call(
        _fused_kernel,
        out_shape=jax.ShapeDtypeStruct((N * T_out, VF_OUT), jnp.float32),
    )(x_flat, f["W2"], f["s1"], f["b1"], f["W3"], f["s2"], f["b2"],
      f["W4"], f["s3"], f["b3"], f["M_avg"])

    return out.reshape(N, T_out, VF_OUT).transpose(0, 2, 1)        # (N, out_C, T')


# ------------------ host-side (one-time) weight folding ----------------------
def fuse_params(p):
    """Fold adjacency / per-vertex convs into dense 2-D weights (done once)."""
    C, V, ws, S, Cm, VF = IN_C, V_NODES, WIN_SIZE, NUM_SCALES, CONV3D_OUT, VF_OUT
    Vp = ws * V

    # W2[c*Vp+u, v'*Cm+cm] = sum_s A[s*Vp+v', u] * w_mlp[s*C+c, cm]
    A = (p["A_scales"] + p["A_res"]).reshape(S, Vp, Vp)            # [s, v', u]
    w_mlp = p["w_mlp"].reshape(S, C, Cm)                           # [s, c, cm]
    W2 = jnp.einsum("svu,scm->cuvm", A, w_mlp).reshape(C * Vp, Vp * Cm)

    eyeV = jnp.eye(V, dtype=jnp.float32)
    # W3[(w*V+v)*Cm+ci, v2*Cm+co] = w3[co, ci, w] * I[v, v2]
    w_out = p["w_out"].reshape(ws, Cm, Cm)                         # [w, ci, co]
    W3 = jnp.einsum("wio,vz->wvizo", w_out, eyeV).reshape(Vp * Cm, V * Cm)

    # W4[v*Cm+ci, v2*VF+co] = w_vf[ci, co] * I[v, v2]
    W4 = jnp.einsum("io,vz->vizo", p["w_vf"], eyeV).reshape(V * Cm, V * VF)

    # Mean over vertices: M[v*VF+co, co2] = (1/V) * I[co, co2]
    M_avg = jnp.tile(jnp.eye(VF, dtype=jnp.float32), (V, 1)) / V   # (V*VF, VF)

    return dict(
        W2=W2,
        s1=jnp.tile(p["mlp_scale"], Vp)[None, :],
        b1=jnp.tile(p["mlp_shift"], Vp)[None, :],
        W3=W3,
        s2=jnp.tile(p["out_scale"], V)[None, :],
        b2=jnp.tile(p["out_shift"], V)[None, :],
        W4=W4,
        s3=jnp.tile(p["vf_scale"], V)[None, :],
        b3=jnp.tile(p["vf_shift"], V)[None, :],
        M_avg=M_avg,
    )


# ------------------------ pure-JAX reference (unfused) ------------------------
def local_feature_reference(x, p):
    N, C, T, V = x.shape
    ws, stride, dil, S, Cm = WIN_SIZE, WIN_STRIDE, WIN_DIL, NUM_SCALES, CONV3D_OUT
    pad = (ws + (ws - 1) * (dil - 1) - 1) // 2
    xp = jnp.pad(x, ((0, 0), (0, 0), (pad, pad), (0, 0)))
    T_out = (T + 2 * pad - dil * (ws - 1) - 1) // stride + 1
    idx = np.arange(T_out)[:, None] * stride + np.arange(ws)[None, :] * dil
    Vp = ws * V
    xw = xp[:, :, idx, :].reshape(N, C, T_out, Vp)

    # SpatialTemporal_MS_GCN: graph aggregation + MLP 1x1 + BN + ReLU
    A = p["A_scales"] + p["A_res"]                                 # (S*Vp, Vp)
    agg = jnp.einsum("vu,nctu->nctv", A, xw)                       # (N,C,T',S*Vp)
    agg = agg.reshape(N, C, T_out, S, Vp).transpose(0, 2, 4, 3, 1)
    agg = agg.reshape(N * T_out * Vp, S * C)
    y = agg @ p["w_mlp"] * p["mlp_scale"] + p["mlp_shift"]
    y = jnp.maximum(y, 0.0)                                        # (N*T'*Vp, Cm)

    # out_conv Conv3d (1, ws, 1) + out_bn
    y = y.reshape(N, T_out, ws, V, Cm).transpose(0, 1, 3, 2, 4)
    y = y.reshape(N * T_out * V, ws * Cm)
    z = y @ p["w_out"] * p["out_scale"] + p["out_shift"]           # (N*T'*V, Cm)

    # VerticesFusion: 1x1 conv + BN + ReLU + mean over vertices
    # TODO(synk): exact VerticesFusion source not provided; implemented per its
    # documented contract (N,in_C,T,V)->(N,out_C,T) as conv1x1+BN+ReLU+mean(V).
    z = z.reshape(N * T_out, V, Cm)
    u = jnp.einsum("bvc,co->bvo", z, p["w_vf"]) * p["vf_scale"] + p["vf_shift"]
    out = jnp.maximum(u, 0.0).mean(axis=1)                         # (N*T', VF_OUT)
    return out.reshape(N, T_out, VF_OUT).transpose(0, 2, 1)


# --------------------------- deterministic params ----------------------------
def fold_bn(conv_bias, gamma, beta, mean, var, eps=BN_EPS):
    s = gamma / jnp.sqrt(var + eps)
    return s, (conv_bias - mean) * s + beta


def init_params(key):
    Vp = WIN_SIZE * V_NODES
    S, C, Cm = NUM_SCALES, IN_C, CONV3D_OUT
    ks = jax.random.split(key, 16)

    A_binary = make_chain_graph(V_NODES)
    A_scales = jnp.asarray(build_A_scales(A_binary, WIN_SIZE, NUM_SCALES))
    A_res = jax.random.uniform(ks[0], (S * Vp, Vp), jnp.float32, -1e-6, 1e-6)

    def bn(k, c):
        k1, k2, k3, k4 = jax.random.split(k, 4)
        gamma = 1.0 + 0.1 * jax.random.normal(k1, (c,), jnp.float32)
        beta = 0.1 * jax.random.normal(k2, (c,), jnp.float32)
        mean = 0.1 * jax.random.normal(k3, (c,), jnp.float32)
        var = 1.0 + 0.1 * jnp.abs(jax.random.normal(k4, (c,), jnp.float32))
        return gamma, beta, mean, var

    # MLP: Conv2d(S*C, Cm, 1) weight (Cm, S*C, 1, 1) + bias, BN2d(Cm)
    w_mlp_t = 0.1 * jax.random.normal(ks[1], (Cm, S * C), jnp.float32)
    b_mlp = 0.1 * jax.random.normal(ks[2], (Cm,), jnp.float32)
    mlp_scale, mlp_shift = fold_bn(b_mlp, *bn(ks[3], Cm))

    # out_conv: Conv3d(Cm, Cm, (1, ws, 1)) weight (Cm, Cm, 1, ws, 1) + bias, BN2d(Cm)
    w3 = 0.1 * jax.random.normal(ks[4], (Cm, Cm, 1, WIN_SIZE, 1), jnp.float32)
    b3 = 0.1 * jax.random.normal(ks[5], (Cm,), jnp.float32)
    # feature order in rows is (w, i) -> weight (ws*Cm, Cm): w_out[w*Cm+i, o] = w3[o,i,w]
    w_out = jnp.transpose(w3[:, :, 0, :, 0], (0, 2, 1)).reshape(Cm, WIN_SIZE * Cm).T
    out_scale, out_shift = fold_bn(b3, *bn(ks[6], Cm))

    # VerticesFusion: Conv2d(Cm, VF_OUT, 1) + BN2d(VF_OUT)
    w_vf_t = 0.1 * jax.random.normal(ks[7], (VF_OUT, Cm), jnp.float32)
    b_vf = 0.1 * jax.random.normal(ks[8], (VF_OUT,), jnp.float32)
    vf_scale, vf_shift = fold_bn(b_vf, *bn(ks[9], VF_OUT))

    return dict(
        A_scales=A_scales, A_res=A_res,
        w_mlp=w_mlp_t.T, mlp_scale=mlp_scale, mlp_shift=mlp_shift,
        w_out=w_out, out_scale=out_scale, out_shift=out_shift,
        w_vf=w_vf_t.T, vf_scale=vf_scale, vf_shift=vf_shift,
    )


# ----------------------------------- main ------------------------------------
if __name__ == "__main__":
    key = jax.random.PRNGKey(0)
    k_x, k_p = jax.random.split(key)
    x = jax.random.normal(k_x, (N_BATCH, IN_C, T_FRAMES, V_NODES), jnp.float32)
    params = init_params(k_p)

    # One-time weight folding (off the per-forward hot path).
    fused = jax.block_until_ready(fuse_params(params))

    out = jax.block_until_ready(local_feature_pallas(x, fused))
    ref = jax.block_until_ready(local_feature_reference(x, params))
    np.testing.assert_allclose(np.asarray(out), np.asarray(ref),
                               rtol=2e-4, atol=2e-4)
    # output layout: (N, vertices_fusion_out_dim, T / window_stride)
    assert out.shape == (N_BATCH, VF_OUT, T_FRAMES // WIN_STRIDE), out.shape
    print("KERNEL_OK")
</pallas_src>

<mosaic_0001>
module attributes {stable_mosaic.version = 11 : i64} {
  func.func @_fused_kernel(%arg0: memref<8x63xf32, #tpu.memory_space<vmem>>, %arg1: memref<63x336xf32, #tpu.memory_space<vmem>>, %arg2: memref<1x336xf32, #tpu.memory_space<vmem>>, %arg3: memref<1x336xf32, #tpu.memory_space<vmem>>, %arg4: memref<336x112xf32, #tpu.memory_space<vmem>>, %arg5: memref<1x112xf32, #tpu.memory_space<vmem>>, %arg6: memref<1x112xf32, #tpu.memory_space<vmem>>, %arg7: memref<112x224xf32, #tpu.memory_space<vmem>>, %arg8: memref<1x224xf32, #tpu.memory_space<vmem>>, %arg9: memref<1x224xf32, #tpu.memory_space<vmem>>, %arg10: memref<224x32xf32, #tpu.memory_space<vmem>>, %arg11: memref<8x32xf32, #tpu.memory_space<vmem>>) attributes {dimension_semantics = [], scalar_prefetch = 0 : i64, scratch_operands = 0 : i64, tpu.core_type = #tpu.core_type<tc>} {
    %c0 = arith.constant 0 : index
    %c0_0 = arith.constant 0 : index
    %0 = vector.load %arg0[%c0, %c0_0] : memref<8x63xf32, #tpu.memory_space<vmem>>, vector<8x63xf32>
    %c0_1 = arith.constant 0 : index
    %c0_2 = arith.constant 0 : index
    %1 = vector.load %arg1[%c0_1, %c0_2] : memref<63x336xf32, #tpu.memory_space<vmem>>, vector<63x336xf32>
    %cst = arith.constant dense<0.000000e+00> : vector<8x336xf32>
    %2 = tpu.matmul %0, %1, %cst {dimension_numbers = #tpu.dot_dimension_numbers<[1], [0], [0], [1], [0, 0, 1, 1], [], []>} : vector<8x63xf32>, vector<63x336xf32>, vector<8x336xf32> -> vector<8x336xf32>
    %c0_3 = arith.constant 0 : index
    %c0_4 = arith.constant 0 : index
    %3 = vector.load %arg2[%c0_3, %c0_4] : memref<1x336xf32, #tpu.memory_space<vmem>>, vector<1x336xf32>
    %4 = vector.broadcast %3 : vector<1x336xf32> to vector<8x336xf32>
    %5 = arith.mulf %2, %4 : vector<8x336xf32>
    %c0_5 = arith.constant 0 : index
    %c0_6 = arith.constant 0 : index
    %6 = vector.load %arg3[%c0_5, %c0_6] : memref<1x336xf32, #tpu.memory_space<vmem>>, vector<1x336xf32>
    %7 = vector.broadcast %6 : vector<1x336xf32> to vector<8x336xf32>
    %8 = arith.addf %5, %7 : vector<8x336xf32>
    %cst_7 = arith.constant 0.000000e+00 : f32
    %9 = vector.broadcast %cst_7 : f32 to vector<8x336xf32>
    %10 = arith.maximumf %8, %9 : vector<8x336xf32>
    %c0_8 = arith.constant 0 : index
    %c0_9 = arith.constant 0 : index
    %11 = vector.load %arg4[%c0_8, %c0_9] : memref<336x112xf32, #tpu.memory_space<vmem>>, vector<336x112xf32>
    %cst_10 = arith.constant dense<0.000000e+00> : vector<8x112xf32>
    %12 = tpu.matmul %10, %11, %cst_10 {dimension_numbers = #tpu.dot_dimension_numbers<[1], [0], [0], [1], [0, 0, 1, 1], [], []>} : vector<8x336xf32>, vector<336x112xf32>, vector<8x112xf32> -> vector<8x112xf32>
    %c0_11 = arith.constant 0 : index
    %c0_12 = arith.constant 0 : index
    %13 = vector.load %arg5[%c0_11, %c0_12] : memref<1x112xf32, #tpu.memory_space<vmem>>, vector<1x112xf32>
    %14 = vector.broadcast %13 : vector<1x112xf32> to vector<8x112xf32>
    %15 = arith.mulf %12, %14 : vector<8x112xf32>
    %c0_13 = arith.constant 0 : index
    %c0_14 = arith.constant 0 : index
    %16 = vector.load %arg6[%c0_13, %c0_14] : memref<1x112xf32, #tpu.memory_space<vmem>>, vector<1x112xf32>
    %17 = vector.broadcast %16 : vector<1x112xf32> to vector<8x112xf32>
    %18 = arith.addf %15, %17 : vector<8x112xf32>
    %c0_15 = arith.constant 0 : index
    %c0_16 = arith.constant 0 : index
    %19 = vector.load %arg7[%c0_15, %c0_16] : memref<112x224xf32, #tpu.memory_space<vmem>>, vector<112x224xf32>
    %cst_17 = arith.constant dense<0.000000e+00> : vector<8x224xf32>
    %20 = tpu.matmul %18, %19, %cst_17 {dimension_numbers = #tpu.dot_dimension_numbers<[1], [0], [0], [1], [0, 0, 1, 1], [], []>} : vector<8x112xf32>, vector<112x224xf32>, vector<8x224xf32> -> vector<8x224xf32>
    %c0_18 = arith.constant 0 : index
    %c0_19 = arith.constant 0 : index
    %21 = vector.load %arg8[%c0_18, %c0_19] : memref<1x224xf32, #tpu.memory_space<vmem>>, vector<1x224xf32>
    %22 = vector.broadcast %21 : vector<1x224xf32> to vector<8x224xf32>
    %23 = arith.mulf %20, %22 : vector<8x224xf32>
    %c0_20 = arith.constant 0 : index
    %c0_21 = arith.constant 0 : index
    %24 = vector.load %arg9[%c0_20, %c0_21] : memref<1x224xf32, #tpu.memory_space<vmem>>, vector<1x224xf32>
    %25 = vector.broadcast %24 : vector<1x224xf32> to vector<8x224xf32>
    %26 = arith.addf %23, %25 : vector<8x224xf32>
    %cst_22 = arith.constant 0.000000e+00 : f32
    %27 = vector.broadcast %cst_22 : f32 to vector<8x224xf32>
    %28 = arith.maximumf %26, %27 : vector<8x224xf32>
    %c0_23 = arith.constant 0 : index
    %c0_24 = arith.constant 0 : index
    %29 = vector.load %arg10[%c0_23, %c0_24] : memref<224x32xf32, #tpu.memory_space<vmem>>, vector<224x32xf32>
    %cst_25 = arith.constant dense<0.000000e+00> : vector<8x32xf32>
    %30 = tpu.matmul %28, %29, %cst_25 {dimension_numbers = #tpu.dot_dimension_numbers<[1], [0], [0], [1], [0, 0, 1, 1], [], []>} : vector<8x224xf32>, vector<224x32xf32>, vector<8x32xf32> -> vector<8x32xf32>
    %c0_26 = arith.constant 0 : index
    %c0_27 = arith.constant 0 : index
    %31 = vector.load %arg11[%c0_26, %c0_27] : memref<8x32xf32, #tpu.memory_space<vmem>>, vector<8x32xf32>
    tpu.vector_store %arg11[%c0_26, %c0_27], %30 {strides = array<i32>} : memref<8x32xf32, #tpu.memory_space<vmem>>, vector<8x32xf32>,
    return
  }
}

</mosaic_0001>

<bundles_post_ra>
// kernel: local_feature_pallas.1
= control target key start
LH: loop header
LB: loop body
LE: loop exit
PB: predicated region body
PF: predicated region fallthrough
CT: control target
= control target key end

     0   :  { %vm68_vm0 = vcmask 1046528   ;;  %vm64_vm1 = vcmask 515072   ;;  %s955_s0 = inlined_call_operand.vmem [shape: f32[8,63], index: 0, kind: input, shape index: {}]   ;;  %s956_s1 = inlined_call_operand.vmem [shape: f32[63,336], index: 1, kind: input, shape index: {}]   ;;  %s957_s2 = inlined_call_operand.vmem [shape: f32[1,336], index: 2, kind: input, shape index: {}]   ;;  %s958_s3 = inlined_call_operand.vmem [shape: f32[1,336], index: 3, kind: input, shape index: {}]   ;;  %s959_s4 = inlined_call_operand.vmem [shape: f32[336,112], index: 4, kind: input, shape index: {}]   ;;  %s960_s5 = inlined_call_operand.vmem [shape: f32[1,112], index: 5, kind: input, shape index: {}]   ;;  %s961_s6 = inlined_call_operand.vmem [shape: f32[1,112], index: 6, kind: input, shape index: {}]   ;;  %s962_s7 = inlined_call_operand.vmem [shape: f32[112,224], index: 7, kind: input, shape index: {}]   ;;  %s963_s8 = inlined_call_operand.vmem [shape: f32[1,224], index: 8, kind: input, shape index: {}]   ;;  %s964_s9 = inlined_call_operand.vmem [shape: f32[1,224], index: 9, kind: input, shape index: {}]   ;;  %s965_s10 = inlined_call_operand.vmem [shape: f32[224,32], index: 10, kind: input, shape index: {}]   ;;  %s966_s11 = inlined_call_operand.hbm [shape: f32[8,32], index: 11, kind: output, shape index: {}]  }
   0x1   :  { %v61_v0 = vld [vmem:[%s956_s1 + $0xa8] sm:$0x7f]  ;;  %v58_v1 = vld [vmem:[%s956_s1 + $0x90] sm:$0xff]  ;;  %v55_v2 = vld [vmem:[%s956_s1 + $0x78] sm:$0xff] }
   0x2   :  { %459 = vmatpush.msk.msra.mxu0 %vm68_vm0, %v61_v0  ;;  %v63_v3 = vld [vmem:[%s956_s1 + $0xb8] sm:$0x7f]  ;;  %v60_v4 = vld [vmem:[%s956_s1 + $0xa0] sm:$0xff]  ;;  %v57_v6 = vld [vmem:[%s956_s1 + $0x88] sm:$0xff] }
   0x3   :  { %463 = vmatpush.msk.msra.mxu2 %vm68_vm0, %v63_v3  ;;  %v52_v5 = vld [vmem:[%s956_s1 + $0x60] sm:$0xff]  ;;  %v49_v7 = vld [vmem:[%s956_s1 + $0x48] sm:$0xff]  ;;  %v54_v8 = vld [vmem:[%s956_s1 + $0x70] sm:$0xff] }
   0x4   :  { %87 = vmatpush.msra.mxu0 %v58_v1  ;;  %v46_v9 = vld [vmem:[%s956_s1 + $0x30] sm:$0xff]  ;;  %v51_v10 = vld [vmem:[%s956_s1 + $0x58] sm:$0xff]  ;;  %v48_v14 = vld [vmem:[%s956_s1 + $0x40] sm:$0xff] }
   0x5   :  { %127 = vmatpush.msra.mxu2 %v60_v4  ;;  %v178_v11 = vld [vmem:[%s959_s4 + $0x78] sm:$0xff]  ;;  %v177_v12 = vld [vmem:[%s959_s4 + $0x70] sm:$0xff]  ;;  %v176_v15 = vld [vmem:[%s959_s4 + $0x68] sm:$0xff] }
   0x6   :  { %88 = vmatpush.msra.mxu0 %v55_v2  ;;  %v43_v13 = vld [vmem:[%s956_s1 + $0x18] sm:$0xff]  ;;  %209 = vmatpush.msra.mxu3 %v178_v11  ;;  %v40_v16 = vld [vmem:[%s956_s1] sm:$0xff]  ;;  %v45_v17 = vld [vmem:[%s956_s1 + $0x28] sm:$0xff] }
   0x7   :  { %128 = vmatpush.msra.mxu2 %v57_v6  ;;  %v62_v18 = vld [vmem:[%s956_s1 + $0xb0] sm:$0x7f]  ;;  %v175_v19 = vld [vmem:[%s959_s4 + $0x60] sm:$0xff]  ;;  %v59_v22 = vld [vmem:[%s956_s1 + $0x98] sm:$0xff] }
   0x8   :  { %89 = vmatpush.msra.mxu0 %v52_v5  ;;  %210 = vmatpush.msra.mxu3 %v177_v12  ;;  %v39_v20 = vld [vmem:[%s955_s0] sm:$0xff]  ;;  %v42_v21 = vld [vmem:[%s956_s1 + $0x10] sm:$0xff]  ;;  %v174_v23 = vld [vmem:[%s959_s4 + $0x58] sm:$0xff] }
   0x9   :  { %129 = vmatpush.msra.mxu2 %v54_v8  ;;  %v204_v24 = vld [vmem:[%s959_s4 + $0x148] sm:$0xff] }
   0xa   :  { %90 = vmatpush.msra.mxu0 %v49_v7  ;;  %211 = vmatpush.msra.mxu3 %v176_v15 }
   0xb   :  { %130 = vmatpush.msra.mxu2 %v51_v10 }
   0xc   :  { %91 = vmatpush.msra.mxu0 %v46_v9  ;;  %212 = vmatpush.msra.mxu3 %v175_v19 }
   0xd   :  { %131 = vmatpush.msra.mxu2 %v48_v14 }
   0xe   :  { %92 = vmatpush.msra.mxu0 %v43_v13 }
   0xf   :  { %132 = vmatpush.msra.mxu2 %v45_v17 }
  0x10   :  { %93 = vmatpush.msra.mxu0 %v40_v16 }
  0x12   :  { %461 = vmatpush.msk.msrb.mxu0 %vm68_vm0, %v62_v18 }
  0x13   :  { %16 = vsyncpa [#allocation3], 0  ;;  %v56_v25 = vld [vmem:[%s956_s1 + $0x80] sm:$0xff]  ;;  %460 = vmatmul.msk.f32.vlgmr.msra.gmra.mxu0 %vm64_vm1, %v39_v20  ;;  %133 = vmatpush.msra.mxu2 %v42_v21  ;;  %v173_v26 = vld [vmem:[%s959_s4 + $0x50] sm:$0xff]  ;;  %vm205_vm2 = vcmask 654336   ;;  %vm307_vm3 = vcmask 916480  }
  0x14   :  { %107 = vmatpush.msrb.mxu0 %v59_v22  ;;  %464 = vmatmul.msk.f32.vlgmr.msra.gmra.mxu2 %vm64_vm1, %v39_v20  ;;  %v53_v27 = vld [vmem:[%s956_s1 + $0x68] sm:$0xff]  ;;  %v50_v29 = vld [vmem:[%s956_s1 + $0x50] sm:$0xff]  ;;  %v171_v30 = vld [vmem:[%s959_s4 + $0x40] sm:$0xff]  ;;  %vm397_vm4 = vcmask 785408   ;;  %vm441_vm5 = vcmask 261120  }
  0x15   :  { %213 = vmatpush.msra.mxu3 %v174_v23  ;;  %255 = vmatpush.msra.mxu1 %v204_v24  ;;  %v172_v28 = vld [vmem:[%s959_s4 + $0x48] sm:$0xff]  ;;  %v47_v31 = vld [vmem:[%s956_s1 + $0x38] sm:$0xff]  ;;  %v44_v33 = vld [vmem:[%s956_s1 + $0x20] sm:$0xff] }
  0x16   :  { %108 = vmatpush.msrb.mxu0 %v56_v25  ;;  %v170_v32 = vld [vmem:[%s959_s4 + $0x38] sm:$0xff]  ;;  %v169_v34 = vld [vmem:[%s959_s4 + $0x30] sm:$0xff]  ;;  %v41_v35 = vld [vmem:[%s956_s1 + $0x8] sm:$0xff] }
  0x17   :  { %214 = vmatpush.msra.mxu3 %v173_v26  ;;  %v168_v36 = vld [vmem:[%s959_s4 + $0x28] sm:$0xff]  ;;  %v194_v37 = vld [vmem:[%s959_s4 + $0xf8] sm:$0xff]  ;;  %v167_v38 = vld [vmem:[%s959_s4 + $0x20] sm:$0xff] }
  0x18   :  { %109 = vmatpush.msrb.mxu0 %v53_v27  ;;  %v193_v39 = vld [vmem:[%s959_s4 + $0xf0] sm:$0xff]  ;;  %v192_v40 = vld [vmem:[%s959_s4 + $0xe8] sm:$0xff]  ;;  %v191_v41 = vld [vmem:[%s959_s4 + $0xe0] sm:$0xff] }
  0x19   :  { %215 = vmatpush.msra.mxu3 %v172_v28  ;;  %v190_v42 = vld [vmem:[%s959_s4 + $0xd8] sm:$0xff]  ;;  %v189_v43 = vld [vmem:[%s959_s4 + $0xd0] sm:$0xff]  ;;  %v188_v44 = vld [vmem:[%s959_s4 + $0xc8] sm:$0xff] }
  0x1a   :  { %110 = vmatpush.msrb.mxu0 %v50_v29  ;;  %v187_v45 = vld [vmem:[%s959_s4 + $0xc0] sm:$0xff]  ;;  %v166_v46 = vld [vmem:[%s959_s4 + $0x18] sm:$0xff]  ;;  %v165_v49 = vld [vmem:[%s959_s4 + $0x10] sm:$0xff] }
  0x1b   :  { %216 = vmatpush.msra.mxu3 %v171_v30  ;;  %v186_v47 = vld [vmem:[%s959_s4 + $0xb8] sm:$0xff]  ;;  %v203_v48 = vld [vmem:[%s959_s4 + $0x140] sm:$0xff]  ;;  %v185_v50 = vld [vmem:[%s959_s4 + $0xb0] sm:$0xff] }
  0x1c   :  { %111 = vmatpush.msrb.mxu0 %v47_v31  ;;  %v202_v51 = vld [vmem:[%s959_s4 + $0x138] sm:$0xff]  ;;  %256 = vmatpush.msra.mxu1 %v203_v48  ;;  %v164_v52 = vld [vmem:[%s959_s4 + $0x8] sm:$0xff]  ;;  %v201_v54 = vld [vmem:[%s959_s4 + $0x130] sm:$0xff] }
  0x1d   :  { %217 = vmatpush.msra.mxu3 %v170_v32  ;;  %v184_v53 = vld [vmem:[%s959_s4 + $0xa8] sm:$0xff]  ;;  %v163_v55 = vld [vmem:[%s959_s4] sm:$0xff]  ;;  %v182_v58 = vld [vmem:[%s959_s4 + $0x98] sm:$0xff] }
  0x1e   :  { %112 = vmatpush.msrb.mxu0 %v44_v33  ;;  %257 = vmatpush.msra.mxu1 %v202_v51  ;;  %v183_v56 = vld [vmem:[%s959_s4 + $0xa0] sm:$0xff]  ;;  %v200_v57 = vld [vmem:[%s959_s4 + $0x128] sm:$0xff]  ;;  %v181_v60 = vld [vmem:[%s959_s4 + $0x90] sm:$0xff] }
  0x1f   :  { %218 = vmatpush.msra.mxu3 %v169_v34  ;;  %v199_v59 = vld [vmem:[%s959_s4 + $0x120] sm:$0xff]  ;;  %v198_v61 = vld [vmem:[%s959_s4 + $0x118] sm:$0xff]  ;;  %v180_v62 = vld [vmem:[%s959_s4 + $0x88] sm:$0xff] }
  0x20   :  { %113 = vmatpush.msrb.mxu0 %v41_v35  ;;  %258 = vmatpush.msra.mxu1 %v201_v54  ;;  %v197_v63 = vld [vmem:[%s959_s4 + $0x110] sm:$0xff]  ;;  %v179_v0 = vld [vmem:[%s959_s4 + $0x80] sm:$0xff]  ;;  %v196_v1 = vld [vmem:[%s959_s4 + $0x108] sm:$0xff] }
  0x21   :  { %462 = vmatmul.msk.f32.vlgmr.msrb.gmra.mxu0 %vm64_vm1, %v39_v20  ;;  %219 = vmatpush.msra.mxu3 %v168_v36  ;;  %v195_v2 = vld [vmem:[%s959_s4 + $0x100] sm:$0xff]  ;;  %v305_v3 = vld [vmem:[%s962_s7 + $0xd0] sm:$0xff]  ;;  %v306_v4 = vld [vmem:[%s962_s7 + $0xd8] sm:$0xff] }
  0x22   :  { %229 = vmatpush.msra.mxu0 %v194_v37  ;;  %259 = vmatpush.msra.mxu1 %v200_v57  ;;  %v303_v5 = vld [vmem:[%s962_s7 + $0xc0] sm:$0xff]  ;;  %v304_v6 = vld [vmem:[%s962_s7 + $0xc8] sm:$0xff]  ;;  %v301_v7 = vld [vmem:[%s962_s7 + $0xb0] sm:$0xff] }
  0x23   :  { %220 = vmatpush.msra.mxu3 %v167_v38  ;;  %313 = vmatpush.msrb.mxu2 %v305_v3  ;;  %v302_v8 = vld [vmem:[%s962_s7 + $0xb8] sm:$0xff]  ;;  %v299_v9 = vld [vmem:[%s962_s7 + $0xa0] sm:$0xff]  ;;  %v300_v11 = vld [vmem:[%s962_s7 + $0xa8] sm:$0xff] }
  0x24   :  { %230 = vmatpush.msra.mxu0 %v193_v39  ;;  %260 = vmatpush.msra.mxu1 %v199_v59  ;;  %v138_v10 = vld [vmem:[%s957_s2] sm:$0x7]  ;;  %v297_v12 = vld [vmem:[%s962_s7 + $0x90] sm:$0xff]  ;;  %v298_v14 = vld [vmem:[%s962_s7 + $0x98] sm:$0xff] }
  0x25   :  { %221 = vmatpush.msra.mxu3 %v166_v46  ;;  %314 = vmatpush.msrb.mxu2 %v303_v5  ;;  %v149_v13 = vld [vmem:[%s958_s3] sm:$0x7]  ;;  %v140_v15 = vperm.slane %v138_v10, 0  ;;  %v296_v17 = vld [vmem:[%s962_s7 + $0x88] sm:$0xff]  ;;  %v293_v19 = vld [vmem:[%s962_s7 + $0x70] sm:$0xff]  ;;  %v142_v26 = vperm.slane %v138_v10, 2 }
  0x26   :  { %231 = vmatpush.msra.mxu0 %v192_v40  ;;  %261 = vmatpush.msra.mxu1 %v198_v61  ;;  %v295_v16 = vld [vmem:[%s962_s7 + $0x80] sm:$0xff]  ;;  %v151_v18 = vperm.slane %v149_v13, 0  ;;  %v294_v21 = vld [vmem:[%s962_s7 + $0x78] sm:$0xff]  ;;  %v292_v24 = vld [vmem:[%s962_s7 + $0x68] sm:$0xff]  ;;  %v153_v28 = vperm.slane %v149_v13, 2  ;;  %v141_v32 = vperm.slane %v138_v10, 1 }
  0x27   :  { %222 = vmatpush.msra.mxu3 %v165_v49  ;;  %315 = vmatpush.msrb.mxu2 %v301_v7  ;;  %v291_v23 = vld [vmem:[%s962_s7 + $0x60] sm:$0xff]  ;;  %v152_v34 = vperm.slane %v149_v13, 1  ;;  %v289_v39 = vld [vmem:[%s962_s7 + $0x50] sm:$0xff]  ;;  %v290_v40 = vld [vmem:[%s962_s7 + $0x58] sm:$0xff] }
  0x28   :  { %232 = vmatpush.msra.mxu0 %v191_v41  ;;  %262 = vmatpush.msra.mxu1 %v197_v63  ;;  %v287_v41 = vld [vmem:[%s962_s7 + $0x40] sm:$0xff]  ;;  %v284_v46 = vld [vmem:[%s962_s7 + $0x28] sm:$0xff]  ;;  %v282_v48 = vld [vmem:[%s962_s7 + $0x18] sm:$0xff] }
  0x29   :  { %223 = vmatpush.msra.mxu3 %v164_v52  ;;  %316 = vmatpush.msrb.mxu2 %v299_v9  ;;  %v279_v49 = vld [vmem:[%s962_s7] sm:$0xff]  ;;  %v384_v51 = vld [vmem:[%s965_s10 + $0x78] sm:$0xff]  ;;  %v383_v52 = vld [vmem:[%s965_s10 + $0x70] sm:$0xff] }
  0x2a   :  { %233 = vmatpush.msra.mxu0 %v190_v42  ;;  %263 = vmatpush.msra.mxu1 %v196_v1  ;;  %v288_v42 = vld [vmem:[%s962_s7 + $0x48] sm:$0xff]  ;;  %v381_v57 = vld [vmem:[%s965_s10 + $0x60] sm:$0xff]  ;;  %v380_v59 = vld [vmem:[%s965_s10 + $0x58] sm:$0xff] }
  0x2b   :  { %224 = vmatpush.msra.mxu3 %v163_v55  ;;  %317 = vmatpush.msrb.mxu2 %v297_v12  ;;  %v382_v54 = vld [vmem:[%s965_s10 + $0x68] sm:$0xff]  ;;  %v395_v55 = vld [vmem:[%s965_s10 + $0xd0] sm:$0xff]  ;;  %v377_v1 = vld [vmem:[%s965_s10 + $0x40] sm:$0xff] }
  0x2c   :  { %234 = vmatpush.msra.mxu0 %v189_v43  ;;  %264 = vmatpush.msra.mxu1 %v195_v2  ;;  %v285_v43 = vld [vmem:[%s962_s7 + $0x30] sm:$0xff]  ;;  %v378_v63 = vld [vmem:[%s965_s10 + $0x48] sm:$0xff]  ;;  %v389_v2 = vld [vmem:[%s965_s10 + $0xa0] sm:$0xff] }
  0x2d   :  { %333 = vmatpush.msrb.mxu3 %v306_v4  ;;  %318 = vmatpush.msrb.mxu2 %v295_v16  ;;  %v379_v61 = vld [vmem:[%s965_s10 + $0x50] sm:$0xff]  ;;  %v376_v3 = vld [vmem:[%s965_s10 + $0x38] sm:$0xff]  ;;  %v374_v5 = vld [vmem:[%s965_s10 + $0x28] sm:$0xff] }
  0x2e   :  { %235 = vmatpush.msra.mxu0 %v188_v44  ;;  %v286_v44 = vld [vmem:[%s962_s7 + $0x38] sm:$0xff]  ;;  %401 = vmatpush.msrb.mxu1 %v384_v51  ;;  %v375_v4 = vld [vmem:[%s965_s10 + $0x30] sm:$0xff]  ;;  %v471_v13 = vld [vmem:[%s961_s6] ss:$0 sm:$0xff] }
  0x2f   :  { %334 = vmatpush.msrb.mxu3 %v304_v6  ;;  %319 = vmatpush.msrb.mxu2 %v293_v19  ;;  %v373_v6 = vld [vmem:[%s965_s10 + $0x20] sm:$0xff]  ;;  %v372_v16 = vld [vmem:[%s965_s10 + $0x18] sm:$0xff]  ;;  %v387_v19 = vld [vmem:[%s965_s10 + $0x90] sm:$0xff] }
  0x30   :  { %236 = vmatpush.msra.mxu0 %v187_v45  ;;  %v283_v45 = vld [vmem:[%s962_s7 + $0x20] sm:$0xff]  ;;  %402 = vmatpush.msrb.mxu1 %v383_v52 }
  0x31   :  { %335 = vmatpush.msrb.mxu3 %v302_v8  ;;  %320 = vmatpush.msrb.mxu2 %v291_v23  ;;  %v385_v23 = vld [vmem:[%s965_s10 + $0x80] sm:$0xff] }
  0x32   :  { %237 = vmatpush.msra.mxu0 %v186_v47  ;;  %v281_v47 = vld [vmem:[%s962_s7 + $0x10] sm:$0xff]  ;;  %403 = vmatpush.msrb.mxu1 %v382_v54 }
  0x33   :  { %336 = vmatpush.msrb.mxu3 %v300_v11  ;;  %321 = vmatpush.msrb.mxu2 %v289_v39  ;;  %v470_v11 = vld [vmem:[%s960_s5] ss:$0 sm:$0xff] }
  0x34   :  { %238 = vmatpush.msra.mxu0 %v185_v50  ;;  %v280_v50 = vld [vmem:[%s962_s7 + $0x8] sm:$0xff]  ;;  %404 = vmatpush.msrb.mxu1 %v381_v57 }
  0x35   :  { %337 = vmatpush.msrb.mxu3 %v298_v14  ;;  %322 = vmatpush.msrb.mxu2 %v287_v41 }
  0x36   :  { %239 = vmatpush.msra.mxu0 %v184_v53  ;;  %v396_v53 = vld [vmem:[%s965_s10 + $0xd8] sm:$0xff]  ;;  %405 = vmatpush.msrb.mxu1 %v380_v59 }
  0x37   :  { %338 = vmatpush.msrb.mxu3 %v296_v17  ;;  %323 = vmatpush.msrb.mxu2 %v285_v43  ;;  %v388_v17 = vld [vmem:[%s965_s10 + $0x98] sm:$0xff] }
  0x38   :  { %240 = vmatpush.msra.mxu0 %v183_v56  ;;  %v394_v56 = vld [vmem:[%s965_s10 + $0xc8] sm:$0xff]  ;;  %406 = vmatpush.msrb.mxu1 %v379_v61 }
  0x39   :  { %339 = vmatpush.msrb.mxu3 %v294_v21  ;;  %324 = vmatpush.msrb.mxu2 %v283_v45  ;;  %v386_v21 = vld [vmem:[%s965_s10 + $0x88] sm:$0xff] }
  0x3a   :  { %241 = vmatpush.msra.mxu0 %v182_v58  ;;  %v393_v58 = vld [vmem:[%s965_s10 + $0xc0] sm:$0xff]  ;;  %407 = vmatpush.msrb.mxu1 %v378_v63 }
  0x3b   :  { %340 = vmatpush.msrb.mxu3 %v292_v24  ;;  %325 = vmatpush.msrb.mxu2 %v281_v47  ;;  %v351_v24 = vld [vmem:[%s963_s8] sm:$0x3]  ;;  %s498_s8 = smov [#allocation2]  }
  0x3c   :  { %242 = vmatpush.msra.mxu0 %v181_v60  ;;  %v392_v60 = vld [vmem:[%s965_s10 + $0xb8] sm:$0xff]  ;;  %408 = vmatpush.msrb.mxu1 %v377_v1 }
  0x3d   :  { %341 = vmatpush.msrb.mxu3 %v290_v40  ;;  %326 = vmatpush.msrb.mxu2 %v279_v49 }
  0x3e   :  { %243 = vmatpush.msra.mxu0 %v180_v62  ;;  %v391_v62 = vld [vmem:[%s965_s10 + $0xb0] sm:$0xff]  ;;  %409 = vmatpush.msrb.mxu1 %v376_v3 }
  0x3f   :  { %342 = vmatpush.msrb.mxu3 %v288_v42  ;;  %425 = vmatpush.msra.mxu2 %v396_v53 }
  0x40   :  { %244 = vmatpush.msra.mxu0 %v179_v0  ;;  %v390_v0 = vld [vmem:[%s965_s10 + $0xa8] sm:$0xff]  ;;  %410 = vmatpush.msrb.mxu1 %v375_v4 }
  0x41   :  { %343 = vmatpush.msrb.mxu3 %v286_v44  ;;  %426 = vmatpush.msra.mxu2 %v395_v55 }
  0x42   :  { %411 = vmatpush.msrb.mxu1 %v374_v5 }
  0x43   :  { %344 = vmatpush.msrb.mxu3 %v284_v46  ;;  %427 = vmatpush.msra.mxu2 %v394_v56 }
  0x44   :  { %412 = vmatpush.msrb.mxu1 %v373_v6 }
  0x45   :  { %345 = vmatpush.msrb.mxu3 %v282_v48  ;;  %428 = vmatpush.msra.mxu2 %v393_v58 }
  0x46   :  { %413 = vmatpush.msrb.mxu1 %v372_v16 }
  0x47   :  { %346 = vmatpush.msrb.mxu3 %v280_v50  ;;  %429 = vmatpush.msra.mxu2 %v392_v60 }
  0x49   :  { %430 = vmatpush.msra.mxu2 %v391_v62 }
  0x4b   :  { %431 = vmatpush.msra.mxu2 %v390_v0 }
  0x4d   :  { %432 = vmatpush.msra.mxu2 %v389_v2 }
  0x4f   :  { %433 = vmatpush.msra.mxu2 %v388_v17 }
  0x51   :  { %434 = vmatpush.msra.mxu2 %v387_v19 }
  0x53   :  { %435 = vmatpush.msra.mxu2 %v386_v21 }
  0x55   :  { %436 = vmatpush.msra.mxu2 %v385_v23 }
  0x90   :  { %v95_v20 = vpop.f32.mrf.mxu0 }
  0x91   :  { %v146_v22 = vmul.f32 %v140_v15, %v95_v20  ;;  %v370_v20 = vld [vmem:[%s965_s10 + $0x8] sm:$0xff] }
  0x93   :  { %v157_v25 = vadd.f32 %v151_v18, %v146_v22  ;;  %v371_v18 = vld [vmem:[%s965_s10 + $0x10] sm:$0xff]  ;;  %v369_v22 = vld [vmem:[%s965_s10] sm:$0xff]  ;;  %s448_s10 = sshll.u32 %s498_s8, 4  ;;  %s449_s10 = int_to_ptr.vmem [resolvable:$true] %s448_s10 }
  0x94   :  { %414 = vmatpush.msrb.mxu1 %v371_v18 }
  0x95   :  { %v160_v27 = vmax.f32 %v157_v25, 0.0  ;;  %v359_v25 = vld [vmem:[%s964_s9] sm:$0x3]  ;;  %s450_s9 = sshll.u32 %s966_s11, 4  ;;  %s451_s9 = int_to_ptr.hbm [resolvable:$true] %s450_s9 }
  0x96   :  { %415 = vmatpush.msrb.mxu1 %v370_v20 }
  0x97   :  { %225 = vmatmul.f32.vlgmr.msra.gmra.mxu3 %v160_v27  ;;  %v135_v29 = vpop.f32.mrf.mxu2  ;;  %v354_v27 = vperm.slane %v351_v24, 1 }
  0x98   :  { %v148_v30 = vmul.f32 %v142_v26, %v135_v29  ;;  %416 = vmatpush.msrb.mxu1 %v369_v22  ;;  %v353_v26 = vperm.slane %v351_v24, 0  ;;  %v362_v29 = vperm.slane %v359_v25, 1 }
  0x9a   :  { %v159_v31 = vadd.f32 %v153_v28, %v148_v30  ;;  %v361_v28 = vperm.slane %v359_v25, 0 }
  0x9c   :  { %v162_v33 = vmax.f32 %v159_v31, 0.0 }
  0x9e   :  { %v115_v35 = vpop.f32.mrf.mxu0  ;;  %465 = vmatmul.msk.f32.vlgmr.msra.gmra.mxu1 %vm205_vm2, %v162_v33 }
  0x9f   :  { %v147_v36 = vmul.f32 %v141_v32, %v115_v35 }
  0xa1   :  { %v158_v37 = vadd.f32 %v152_v34, %v147_v36 }
  0xa3   :  { %v161_v38 = vmax.f32 %v158_v37, 0.0 }
  0xa5   :  { %245 = vmatmul.f32.vlgmr.msra.gmra.mxu0 %v161_v38 }
 0x11a   :  { %v226_v7 = vpop.f32.mrf.mxu3 }
 0x11b   :  { %v266_v9 = vpop.f32.mrf.mxu1 }
 0x122   :  { %v246_v8 = vpop.f32.mrf.mxu0 }
 0x123   :  { %v247_v10 = vadd.f32 %v246_v8, %v226_v7 }
 0x125   :  { %v267_v12 = vadd.f32 %v266_v9, %v247_v10 }
 0x127   :  { %v273_v14 = vmul.f32 %v470_v11, %v267_v12 }
 0x129   :  { %v278_v15 = vadd.f32 %v471_v13, %v273_v14 }
 0x12b   :  { %466 = vmatmul.msk.f32.vlgmr.msrb.gmra.mxu2 %vm307_vm3, %v278_v15  ;;  %467 = vmatmul.msk.f32.vlgmr.msrb.gmra.mxu3 %vm307_vm3, %v278_v15 }
 0x1ae   :  { %v328_v30 = vpop.f32.mrf.mxu2  ;;  %v348_v31 = vpop.f32.mrf.mxu3 }
 0x1af   :  { %v357_v32 = vmul.f32 %v353_v26, %v328_v30  ;;  %v358_v33 = vmul.f32 %v354_v27, %v348_v31 }
 0x1b1   :  { %v365_v34 = vadd.f32 %v361_v28, %v357_v32  ;;  %v366_v35 = vadd.f32 %v362_v29, %v358_v33 }
 0x1b3   :  { %v367_v36 = vmax.f32 %v365_v34, 0.0  ;;  %v368_v37 = vmax.f32 %v366_v35, 0.0 }
 0x1b5   :  { %417 = vmatmul.f32.vlgmr.msrb.gmra.mxu1 %v367_v36  ;;  %468 = vmatmul.msk.f32.vlgmr.msra.gmra.mxu2 %vm397_vm4, %v368_v37 }
 0x232   :  { %v418_v38 = vpop.f32.mrf.mxu1 }
 0x238   :  { %v438_v39 = vpop.f32.mrf.mxu2 }
 0x239   :  { %v439_v40 = vadd.f32 %v438_v39, %v418_v38 }
 0x23b   :  { %442 = vst.msk [vmem:[#allocation2] sm:$0xff] %vm441_vm5, %v439_v40 }
 0x23c   :  { %453 = dma.vmem_to_hbm [thread:$0]  %s449_s10, 128, %s451_s9, [#allocation3]  }
 0x23d   :  { %496 = dma.done.wait [#allocation3], 128  }
 0x23e   :  { %497 = vsyncadd [#allocation3], 4294967168 }
 0x23f   :  { %458 = vsyncpa [#allocation3], 1 }

</bundles_post_ra>
